<compile_context>
chip_gen: v5e
topology: v5e:2x2
jax: 0.10.0
libtpu: 0.0.40
codegen_flags: <defaults>
</compile_context>

<pallas_src>
import functools

import jax
import jax.numpy as jnp
from jax import lax
from jax.experimental import pallas as pl
from jax.experimental.pallas import tpu as pltpu

EPS = 1e-6
_DEFAULT_VMEM_CAP = 64 * 1024 * 1024   # conservative fallback (v7x size)


def _round_up(x, m):
    return ((x + m - 1) // m) * m


def _vmem_caps():
    """Generation-aware VMEM (budget for resident tiles, scoped limit)."""
    cap = _DEFAULT_VMEM_CAP
    try:
        info = pltpu.get_tpu_info()
        cap = int(getattr(info, "vmem_capacity_bytes", None) or cap)
    except Exception:
        pass
    budget = int(cap * 0.62)      # resident tiles + in-kernel temporaries
    limit = int(cap * 0.72)       # scoped VMEM request, leave compiler headroom
    return budget, limit


def _vmem_estimate(tile_m, tile_n, in_dim, x_isz, w_isz, o_isz):
    buf = 2                                             # default double buffering
    xb = buf * tile_m * in_dim * x_isz                  # x tile
    wb = buf * in_dim * tile_n * w_isz                  # W tile
    ob = buf * tile_m * tile_n * o_isz                  # out tile
    params = buf * (2 * in_dim * 4 + tile_n * 4)        # gamma/beta/bias
    scratch = tile_m * in_dim * w_isz                   # LN cache (single buffer)
    tmp = 2 * tile_m * in_dim * 4 + tile_m * tile_n * 4  # f32 LN temps + accumulator
    return xb + wb + ob + params + scratch + tmp


def tail_kernel(x_ref, gamma_ref, beta_ref, w_ref, b_ref, o_ref, y_ref,
                *, cache_ln):
    """LayerNorm (channels_last, biased var, eps=1e-6) + Linear.

    y_ref: VMEM scratch (tile_m, in_dim) in W's dtype.  With cache_ln=True it
    is filled only on the first out-dim grid step (j == 0) and reused for all
    W tiles of the same row tile.
    """

    def compute_ln():
        x = x_ref[...].astype(jnp.float32)
        mean = jnp.mean(x, axis=-1, keepdims=True)
        centered = x - mean
        var = jnp.mean(centered * centered, axis=-1, keepdims=True)
        xn = centered * lax.rsqrt(var + EPS)
        y = (xn * gamma_ref[...].astype(jnp.float32)
             + beta_ref[...].astype(jnp.float32))
        y_ref[...] = y.astype(y_ref.dtype)

    if cache_ln:
        pl.when(pl.program_id(1) == 0)(compute_ln)
    else:
        compute_ln()

    out = jnp.dot(y_ref[...], w_ref[...], preferred_element_type=jnp.float32)
    out = out + b_ref[...].astype(jnp.float32)
    o_ref[...] = out.astype(o_ref.dtype)


def tail_forward(x, gamma, beta, w, b, *, tile_m=640, tile_n=512):
    """x: (..., in_dim) -> (..., out_dim).  w: (in_dim, out_dim)."""
    in_dim = x.shape[-1]
    out_dim = w.shape[-1]
    lead_shape = x.shape[:-1]
    M = 1
    for d in lead_shape:
        M *= d

    x_isz = jnp.dtype(x.dtype).itemsize
    w_isz = jnp.dtype(w.dtype).itemsize
    o_isz = x_isz

    # sublane packing of the activation dtype: 8 rows f32, 16 bf16, 32 int8
    row_align = 8 * max(1, 4 // max(1, x_isz))

    tile_m = max(row_align,
                 min(_round_up(tile_m, row_align), _round_up(M, row_align)))
    n128 = _round_up(out_dim, 128)
    tile_n = max(128, min(_round_up(tile_n, 128), n128))

    budget, vmem_limit = _vmem_caps()
    # Shrink order (perf review): tile_n first (floor 256, then 128); keep
    # tile_m tall so W re-streaming stays amortized; tile_m last resort.
    while _vmem_estimate(tile_m, tile_n, in_dim, x_isz, w_isz, o_isz) > budget:
        if tile_n > 256:
            tile_n = max(256, _round_up(tile_n // 2, 128))
        elif tile_m > 512:
            tile_m = max(512, _round_up(tile_m // 2, row_align))
        elif tile_n > 128:
            tile_n = 128
        elif tile_m > row_align:
            tile_m = max(row_align, _round_up(tile_m // 2, row_align))
        else:
            break
    # TODO(synk): for very large in_dim on v7x a K-tiled variant (W tiled along
    # in_dim with an f32 accumulator + third "arbitrary" grid axis) would keep
    # tile_m tall; not needed at the shapes this module is used with.

    x2 = x.reshape(M, in_dim)
    gamma2 = gamma.reshape(1, in_dim)
    beta2 = beta.reshape(1, in_dim)
    b2 = b.reshape(1, out_dim)

    grid = (pl.cdiv(M, tile_m), pl.cdiv(out_dim, tile_n))
    m_tiles, n_tiles = grid

    # The LN cache needs the out-dim axis iterated sequentially ("arbitrary").
    # If there is only one row tile but many out-dim tiles (LM-head regime),
    # drop the cache and mark both axes parallel (v7x megacore shards along N).
    cache_ln = not (m_tiles == 1 and n_tiles > 1)
    dim_sem = ("parallel", "arbitrary") if cache_ln else ("parallel", "parallel")

    cost = pl.CostEstimate(
        flops=2 * (m_tiles * tile_m) * in_dim * (n_tiles * tile_n),
        transcendentals=m_tiles * tile_m * (1 if cache_ln else n_tiles),
        bytes_accessed=(m_tiles * tile_m * in_dim * x_isz
                        + m_tiles * in_dim * n_tiles * tile_n * w_isz  # W per row tile
                        + m_tiles * tile_m * n_tiles * tile_n * o_isz
                        + 2 * in_dim * 4 + out_dim * w_isz),
    )

    out = pl.pallas_call(
        functools.partial(tail_kernel, cache_ln=cache_ln),
        out_shape=jax.ShapeDtypeStruct((M, out_dim), x.dtype),
        grid_spec=pltpu.PrefetchScalarGridSpec(
            num_scalar_prefetch=0,
            grid=grid,
            in_specs=[
                pl.BlockSpec((tile_m, in_dim), lambda i, j: (i, 0)),   # x tile
                pl.BlockSpec((1, in_dim), lambda i, j: (0, 0)),        # gamma
                pl.BlockSpec((1, in_dim), lambda i, j: (0, 0)),        # beta
                pl.BlockSpec((in_dim, tile_n), lambda i, j: (0, j)),   # W tile
                pl.BlockSpec((1, tile_n), lambda i, j: (0, j)),        # bias
            ],
            out_specs=pl.BlockSpec((tile_m, tile_n), lambda i, j: (i, j)),
            scratch_shapes=[pltpu.VMEM((tile_m, in_dim), w.dtype)],    # LN cache
        ),
        compiler_params=pltpu.CompilerParams(
            dimension_semantics=dim_sem,
            vmem_limit_bytes=vmem_limit,
        ),
        cost_estimate=cost,
    )(x2, gamma2, beta2, w, b2)

    return out.reshape(*lead_shape, out_dim)


def reference_forward(x, gamma, beta, w, b):
    xf = x.astype(jnp.float32)
    mean = jnp.mean(xf, axis=-1, keepdims=True)
    var = jnp.mean((xf - mean) ** 2, axis=-1, keepdims=True)
    xn = (xf - mean) / jnp.sqrt(var + EPS)
    y = xn * gamma.astype(jnp.float32) + beta.astype(jnp.float32)
    out = y @ w.astype(jnp.float32) + b.astype(jnp.float32)
    return out.astype(x.dtype)


if __name__ == "__main__":
    key = jax.random.PRNGKey(0)
    kx, kw, kb, kx2, kw2, kb2, kx3, kw3, kb3 = jax.random.split(key, 9)

    # --- test 1: small f32 shape (matches the PyTorch module), unaligned out_dim
    batch, seq, in_dim, out_dim = 2, 8, 32, 16
    x = jax.random.normal(kx, (batch, seq, in_dim), dtype=jnp.float32)
    gamma = jnp.ones((in_dim,), dtype=jnp.float32)       # LayerNorm weight
    beta = jnp.zeros((in_dim,), dtype=jnp.float32)       # LayerNorm bias
    w = jax.random.normal(kw, (in_dim, out_dim), dtype=jnp.float32) * 0.05
    b = jax.random.normal(kb, (out_dim,), dtype=jnp.float32) * 0.05

    out = jax.block_until_ready(tail_forward(x, gamma, beta, w, b))
    ref = reference_forward(x, gamma, beta, w, b)
    assert out.shape == (batch, seq, out_dim), out.shape
    assert jnp.allclose(out, ref, atol=1e-4, rtol=1e-4), \
        float(jnp.max(jnp.abs(out - ref)))

    # --- test 2: bf16 path, multi-tile (2x2) grid, LN cache across j ----------
    b2_, s2_, d_in, d_out = 4, 64, 256, 256
    xb = jax.random.normal(kx2, (b2_, s2_, d_in), dtype=jnp.float32).astype(jnp.bfloat16)
    gb = jnp.ones((d_in,), dtype=jnp.bfloat16)
    bb = jnp.zeros((d_in,), dtype=jnp.bfloat16)
    wb = (jax.random.normal(kw2, (d_in, d_out), dtype=jnp.float32) * 0.05).astype(jnp.bfloat16)
    lb = (jax.random.normal(kb2, (d_out,), dtype=jnp.float32) * 0.05).astype(jnp.bfloat16)

    out_b = jax.block_until_ready(
        tail_forward(xb, gb, bb, wb, lb, tile_m=128, tile_n=128))
    ref_b = reference_forward(xb, gb, bb, wb, lb)
    assert out_b.shape == (b2_, s2_, d_out), out_b.shape
    assert jnp.allclose(out_b.astype(jnp.float32), ref_b.astype(jnp.float32),
                        atol=8e-2, rtol=8e-2), \
        float(jnp.max(jnp.abs(out_b.astype(jnp.float32) - ref_b.astype(jnp.float32))))

    # --- test 3: one row tile, several out-dim tiles (no LN cache, both parallel)
    b3_, s3_, d3_in, d3_out = 2, 8, 128, 384
    x3 = jax.random.normal(kx3, (b3_, s3_, d3_in), dtype=jnp.float32)
    g3 = jnp.ones((d3_in,), dtype=jnp.float32)
    be3 = jnp.zeros((d3_in,), dtype=jnp.float32)
    w3 = jax.random.normal(kw3, (d3_in, d3_out), dtype=jnp.float32) * 0.05
    l3 = jax.random.normal(kb3, (d3_out,), dtype=jnp.float32) * 0.05

    out3 = jax.block_until_ready(
        tail_forward(x3, g3, be3, w3, l3, tile_m=512, tile_n=128))
    ref3 = reference_forward(x3, g3, be3, w3, l3)
    assert out3.shape == (b3_, s3_, d3_out), out3.shape
    assert jnp.allclose(out3, ref3, atol=1e-4, rtol=1e-4), \
        float(jnp.max(jnp.abs(out3 - ref3)))

    print("KERNEL_OK")
</pallas_src>

<mosaic_0001>
module attributes {stable_mosaic.version = 11 : i64} {
  func.func @tail_kernel(%arg0: i32, %arg1: i32, %arg2: memref<16x32xf32, #tpu.memory_space<vmem>>, %arg3: memref<1x32xf32, #tpu.memory_space<vmem>>, %arg4: memref<1x32xf32, #tpu.memory_space<vmem>>, %arg5: memref<32x128xf32, #tpu.memory_space<vmem>>, %arg6: memref<1x128xf32, #tpu.memory_space<vmem>>, %arg7: memref<16x128xf32, #tpu.memory_space<vmem>>, %arg8: memref<16x32xf32, #tpu.memory_space<vmem>>) attributes {dimension_semantics = [#tpu.dimension_semantics<parallel>, #tpu.dimension_semantics<arbitrary>], iteration_bounds = array<i64: 1, 1>, scalar_prefetch = 0 : i64, scratch_operands = 1 : i64, tpu.core_type = #tpu.core_type<tc>, window_params = [{transform_indices = @transform_0, window_bounds = array<i64: 16, 32>}, {pipeline_mode = #tpu.pipeline_mode<synchronous>, transform_indices = @transform_1, window_bounds = array<i64: 1, 32>}, {pipeline_mode = #tpu.pipeline_mode<synchronous>, transform_indices = @transform_2, window_bounds = array<i64: 1, 32>}, {transform_indices = @transform_3, window_bounds = array<i64: 32, 128>}, {transform_indices = @transform_4, window_bounds = array<i64: 1, 128>}, {transform_indices = @transform_5, window_bounds = array<i64: 16, 128>}]} {
    %c0_i32 = arith.constant 0 : i32
    %0 = arith.cmpi eq, %arg1, %c0_i32 : i32
    %1 = arith.extui %0 : i1 to i32
    %c0_i32_0 = arith.constant 0 : i32
    %2 = arith.cmpi ne, %1, %c0_i32_0 : i32
    scf.if %2 {
      %c0_8 = arith.constant 0 : index
      %c0_9 = arith.constant 0 : index
      %10 = vector.load %arg2[%c0_8, %c0_9] : memref<16x32xf32, #tpu.memory_space<vmem>>, vector<16x32xf32>
      %cst_10 = arith.constant dense<0.000000e+00> : vector<16xf32>
      %11 = vector.multi_reduction <add>, %10, %cst_10 [1] : vector<16x32xf32> to vector<16xf32>
      %12 = vector.shape_cast %11 : vector<16xf32> to vector<16x1xf32>
      %cst_11 = arith.constant 3.200000e+01 : f32
      %13 = vector.broadcast %cst_11 : f32 to vector<16x1xf32>
      %14 = arith.divf %12, %13 : vector<16x1xf32>
      %15 = vector.broadcast %14 : vector<16x1xf32> to vector<16x32xf32>
      %16 = arith.subf %10, %15 : vector<16x32xf32>
      %17 = arith.mulf %16, %16 : vector<16x32xf32>
      %cst_12 = arith.constant dense<0.000000e+00> : vector<16xf32>
      %18 = vector.multi_reduction <add>, %17, %cst_12 [1] : vector<16x32xf32> to vector<16xf32>
      %19 = vector.shape_cast %18 : vector<16xf32> to vector<16x1xf32>
      %cst_13 = arith.constant 3.200000e+01 : f32
      %20 = vector.broadcast %cst_13 : f32 to vector<16x1xf32>
      %21 = arith.divf %19, %20 : vector<16x1xf32>
      %cst_14 = arith.constant 9.99999997E-7 : f32
      %22 = vector.broadcast %cst_14 : f32 to vector<16x1xf32>
      %23 = arith.addf %21, %22 : vector<16x1xf32>
      %24 = math.rsqrt %23 : vector<16x1xf32>
      %25 = vector.broadcast %24 : vector<16x1xf32> to vector<16x32xf32>
      %26 = arith.mulf %16, %25 : vector<16x32xf32>
      %c0_15 = arith.constant 0 : index
      %c0_16 = arith.constant 0 : index
      %27 = vector.load %arg3[%c0_15, %c0_16] : memref<1x32xf32, #tpu.memory_space<vmem>>, vector<1x32xf32>
      %28 = vector.broadcast %27 : vector<1x32xf32> to vector<16x32xf32>
      %29 = arith.mulf %26, %28 : vector<16x32xf32>
      %c0_17 = arith.constant 0 : index
      %c0_18 = arith.constant 0 : index
      %30 = vector.load %arg4[%c0_17, %c0_18] : memref<1x32xf32, #tpu.memory_space<vmem>>, vector<1x32xf32>
      %31 = vector.broadcast %30 : vector<1x32xf32> to vector<16x32xf32>
      %32 = arith.addf %29, %31 : vector<16x32xf32>
      %c0_19 = arith.constant 0 : index
      %c0_20 = arith.constant 0 : index
      %33 = vector.load %arg8[%c0_19, %c0_20] : memref<16x32xf32, #tpu.memory_space<vmem>>, vector<16x32xf32>
      tpu.vector_store %arg8[%c0_19, %c0_20], %32 {strides = array<i32>} : memref<16x32xf32, #tpu.memory_space<vmem>>, vector<16x32xf32>,
    } else {
    }
    %c0 = arith.constant 0 : index
    %c0_1 = arith.constant 0 : index
    %3 = vector.load %arg8[%c0, %c0_1] : memref<16x32xf32, #tpu.memory_space<vmem>>, vector<16x32xf32>
    %c0_2 = arith.constant 0 : index
    %c0_3 = arith.constant 0 : index
    %4 = vector.load %arg5[%c0_2, %c0_3] : memref<32x128xf32, #tpu.memory_space<vmem>>, vector<32x128xf32>
    %cst = arith.constant dense<0.000000e+00> : vector<16x128xf32>
    %5 = tpu.matmul %3, %4, %cst {dimension_numbers = #tpu.dot_dimension_numbers<[1], [0], [0], [1], [0, 0, 1, 1], [], []>} : vector<16x32xf32>, vector<32x128xf32>, vector<16x128xf32> -> vector<16x128xf32>
    %c0_4 = arith.constant 0 : index
    %c0_5 = arith.constant 0 : index
    %6 = vector.load %arg6[%c0_4, %c0_5] : memref<1x128xf32, #tpu.memory_space<vmem>>, vector<1x128xf32>
    %7 = vector.broadcast %6 : vector<1x128xf32> to vector<16x128xf32>
    %8 = arith.addf %5, %7 : vector<16x128xf32>
    %c0_6 = arith.constant 0 : index
    %c0_7 = arith.constant 0 : index
    %9 = vector.load %arg7[%c0_6, %c0_7] : memref<16x128xf32, #tpu.memory_space<vmem>>, vector<16x128xf32>
    tpu.vector_store %arg7[%c0_6, %c0_7], %8 {strides = array<i32>} : memref<16x128xf32, #tpu.memory_space<vmem>>, vector<16x128xf32>,
    return
  }
  func.func @transform_0(%arg0: i32, %arg1: i32) -> (i32, i32) {
    %c0_i32 = arith.constant 0 : i32
    %c0_i32_0 = arith.constant 0 : i32
    return %arg0, %c0_i32 : i32, i32
  }
  func.func @transform_1(%arg0: i32, %arg1: i32) -> (i32, i32) {
    %c0_i32 = arith.constant 0 : i32
    %c0_i32_0 = arith.constant 0 : i32
    %c0_i32_1 = arith.constant 0 : i32
    return %c0_i32, %c0_i32_0 : i32, i32
  }
  func.func @transform_2(%arg0: i32, %arg1: i32) -> (i32, i32) {
    %c0_i32 = arith.constant 0 : i32
    %c0_i32_0 = arith.constant 0 : i32
    %c0_i32_1 = arith.constant 0 : i32
    return %c0_i32, %c0_i32_0 : i32, i32
  }
  func.func @transform_3(%arg0: i32, %arg1: i32) -> (i32, i32) {
    %c0_i32 = arith.constant 0 : i32
    %c0_i32_0 = arith.constant 0 : i32
    return %c0_i32, %arg1 : i32, i32
  }
  func.func @transform_4(%arg0: i32, %arg1: i32) -> (i32, i32) {
    %c0_i32 = arith.constant 0 : i32
    %c0_i32_0 = arith.constant 0 : i32
    return %c0_i32, %arg1 : i32, i32
  }
  func.func @transform_5(%arg0: i32, %arg1: i32) -> (i32, i32) {
    %c0_i32 = arith.constant 0 : i32
    return %arg0, %arg1 : i32, i32
  }
}

</mosaic_0001>

<bundles_post_ra>
// kernel: tpu_custom_call.1
= control target key start
LH: loop header
LB: loop body
LE: loop exit
PB: predicated region body
PF: predicated region fallthrough
CT: control target
= control target key end

     0   :  { %vm27_vm0 = vcmask 261120   ;;  %s270_s0 = inlined_call_operand.vmem [shape: f32[16,32], index: 0, kind: input, shape index: {}]   ;;  %s271_s1 = inlined_call_operand.vmem [shape: f32[1,32], index: 1, kind: input, shape index: {}]   ;;  %s272_s2 = inlined_call_operand.vmem [shape: f32[1,32], index: 2, kind: input, shape index: {}]   ;;  %s273_s3 = inlined_call_operand.vmem [shape: f32[32,16], index: 3, kind: input, shape index: {}]   ;;  %s274_s4 = inlined_call_operand.vmem [shape: f32[1,16], index: 4, kind: input, shape index: {}]   ;;  %s275_s5 = inlined_call_operand.hbm [shape: f32[16,16], index: 5, kind: output, shape index: {}]  }
   0x1   :  { %v25_v0 = vld [vmem:[%s270_s0] sm:$0xff] }
   0x2   :  { %v28_v1 = vsel %vm27_vm0, %v25_v0, 0.0 }
   0x3   :  { %29 = vadd.xlane.f32.xlu0 %v28_v1 }
   0x4   :  { %10 = vsyncpa [#allocation4], 0  ;;  %v26_v2 = vld [vmem:[%s270_s0 + $0x8] sm:$0xff]  ;;  %v198_v4 = vmov 32.0   ;;  %v98_v21 = vld [vmem:[%s273_s3 + $0x18] sm:$0xff]  ;;  %s199_s7 = smov [#allocation3]  }
   0x5   :  { %v31_v3 = vsel %vm27_vm0, %v26_v2, 0.0  ;;  %166 = vrcp.f32 %v198_v4  ;;  %122 = vmatpush.msra.mxu0 %v98_v21  ;;  %155 = vmatpush.msra.mxu1 %v98_v21  ;;  %v97_v22 = vld [vmem:[%s273_s3 + $0x10] sm:$0xff]  ;;  %v96_v25 = vld [vmem:[%s273_s3 + $0x8] sm:$0xff]  ;;  %v95_v27 = vld [vmem:[%s273_s3] sm:$0xff]  ;;  %s139_s8 = sshll.u32 %s199_s7, 4  ;;  %s141_s11 = sshll.u32 %s275_s5, 4  ;;  %s140_s8 = int_to_ptr.vmem [resolvable:$true] %s139_s8  ;;  %s142_s11 = int_to_ptr.hbm [resolvable:$true] %s141_s11 }
   0x6   :  { %v163_v39 = vld [vmem:[%s271_s1] ss:$0 sm:$0xff]  ;;  %s200_s12 = smov 128   ;;  %s201_s13 = smov 8  }
   0x7   :  { %123 = vmatpush.msra.mxu0 %v97_v22  ;;  %156 = vmatpush.msra.mxu1 %v97_v22  ;;  %v164_v42 = vld [vmem:[%s272_s2] ss:$0 sm:$0xff] }
   0x8   :  { %v165_v55 = vld [vmem:[%s274_s4] ss:$0 sm:$0xff] }
   0x9   :  { %124 = vmatpush.msra.mxu0 %v96_v25  ;;  %157 = vmatpush.msra.mxu1 %v96_v25 }
   0xb   :  { %32 = vadd.xlane.f32.xlu0 %v31_v3  ;;  %v167_v5 = vpop.eup %166  ;;  %125 = vmatpush.msra.mxu0 %v95_v27 }
   0xc   :  { %v35_v6 = vmul.f32 32.0, %v167_v5  ;;  %vm39_vm1 = vweird.f32 %v167_v5  ;;  %158 = vmatpush.msra.mxu1 %v95_v27 }
   0xe   :  { %v36_v7 = vsub.f32 1.0, %v35_v6 }
  0x10   :  { %v37_v8 = vmul.f32 %v167_v5, %v36_v7 }
  0x12   :  { %v38_v9 = vadd.f32 %v167_v5, %v37_v8 }
  0x14   :  { %v40_v10 = vsel %vm39_vm1, %v167_v5, %v38_v9 }
  0x76   :  { %v30_v11 = vpop.xlane.xlu0 %29 }
  0x77   :  { %v41_v12 = vmul.f32 %v40_v10, %v30_v11 }
  0x79   :  { %v43_v13 = vsub.f32 %v25_v0, %v41_v12 }
  0x7b   :  { %v45_v14 = vmul.f32 %v43_v13, %v43_v13 }
  0x7d   :  { %v47_v15 = vsel %vm27_vm0, %v45_v14, 0.0 }
  0x7e   :  { %48 = vadd.xlane.f32.xlu1 %v47_v15  ;;  %v33_v16 = vpop.xlane.xlu0 %32 }
  0x7f   :  { %v42_v17 = vmul.f32 %v40_v10, %v33_v16 }
  0x81   :  { %v44_v18 = vsub.f32 %v26_v2, %v42_v17 }
  0x83   :  { %v46_v19 = vmul.f32 %v44_v18, %v44_v18 }
  0x85   :  { %v50_v20 = vsel %vm27_vm0, %v46_v19, 0.0 }
  0x86   :  { %51 = vadd.xlane.f32.xlu1 %v50_v20 }
  0xf1   :  { %v49_v23 = vpop.xlane.xlu1 %48 }
  0xf2   :  { %v53_v24 = vmul.f32 %v49_v23, %v40_v10 }
  0xf4   :  { %v55_v26 = vadd.f32 1e-06, %v53_v24 }
  0xf6   :  { %168 = vrsqrt.f32 %v55_v26  ;;  %vm63_vm3 = vweird.f32 %v55_v26 }
  0xf9   :  { %v52_v28 = vpop.xlane.xlu1 %51 }
  0xfa   :  { %v54_v29 = vmul.f32 %v52_v28, %v40_v10 }
  0xfc   :  { %v169_v30 = vpop.eup %168  ;;  %v56_v31 = vadd.f32 1e-06, %v54_v29 }
  0xfd   :  { %v58_v32 = vmul.f32 %v169_v30, %v55_v26  ;;  %vm64_vm2 = vweird.f32 %v169_v30 }
  0xfe   :  { %170 = vrsqrt.f32 %v56_v31  ;;  %vm65_vm4 = vmor %vm63_vm3, %vm64_vm2  ;;  %vm73_vm6 = vweird.f32 %v56_v31 }
  0xff   :  { %v59_v33 = vmul.f32 %v169_v30, %v58_v32 }
 0x101   :  { %v60_v34 = vmul.f32 0.5, %v59_v33 }
 0x103   :  { %v61_v35 = vsub.f32 1.5, %v60_v34 }
 0x104   :  { %v171_v36 = vpop.eup %170 }
 0x105   :  { %v62_v37 = vmul.f32 %v169_v30, %v61_v35  ;;  %v68_v38 = vmul.f32 %v171_v36, %v56_v31  ;;  %vm74_vm5 = vweird.f32 %v171_v36 }
 0x106   :  { %vm75_vm7 = vmor %vm73_vm6, %vm74_vm5 }
 0x107   :  { %v66_v40 = vsel %vm65_vm4, %v169_v30, %v62_v37  ;;  %v69_v41 = vmul.f32 %v171_v36, %v68_v38 }
 0x108   :  { %v77_v43 = vmul.f32 %v66_v40, %v43_v13 }
 0x109   :  { %v70_v44 = vmul.f32 0.5, %v69_v41 }
 0x10a   :  { %v83_v45 = vmul.f32 %v163_v39, %v77_v43 }
 0x10b   :  { %v71_v46 = vsub.f32 1.5, %v70_v44 }
 0x10c   :  { %v89_v47 = vadd.f32 %v164_v42, %v83_v45 }
 0x10d   :  { %v72_v48 = vmul.f32 %v171_v36, %v71_v46 }
 0x10e   :  { %91 = vst.msk [vmem:[#allocation2] sm:$0xff] %vm27_vm0, %v89_v47 }
 0x10f   :  { %v76_v49 = vsel %vm75_vm7, %v171_v36, %v72_v48 }
 0x110   :  { %v78_v50 = vmul.f32 %v76_v49, %v44_v18 }
 0x112   :  { %v84_v51 = vmul.f32 %v163_v39, %v78_v50 }
 0x114   :  { %v90_v52 = vadd.f32 %v164_v42, %v84_v51 }
 0x115   :  { %v93_v53 = vld [vmem:[#allocation2] sm:$0xff] }
 0x116   :  { %92 = vst.msk [vmem:[#allocation2 + $0x8] sm:$0xff] %vm27_vm0, %v90_v52  ;;  %153 = vmatmul.msk.f32.vlgmr.msra.gmra.mxu0 %vm27_vm0, %v93_v53 }
 0x11d   :  { %v94_v54 = vld [vmem:[#allocation2 + $0x8] sm:$0xff] }
 0x11e   :  { %154 = vmatmul.msk.f32.vlgmr.msra.gmra.mxu1 %vm27_vm0, %v94_v54 }
 0x193   :  { %v127_v56 = vpop.f32.mrf.mxu0 }
 0x194   :  { %v128_v57 = vadd.f32 %v165_v55, %v127_v56 }
 0x196   :  { %133 = vst [vmem:[#allocation3] sm:$0xff] %v128_v57 }
 0x19b   :  { %v130_v58 = vpop.f32.mrf.mxu1 }
 0x19c   :  { %v131_v59 = vadd.f32 %v165_v55, %v130_v58 }
 0x19e   :  { %134 = vst [vmem:[#allocation3 + $0x8] sm:$0xff] %v131_v59 }
 0x19f   :  { %147 = dma.vmem_to_hbm [thread:$0]  %s140_s8, 256, %s142_s11, [#allocation4], %s200_s12, %s200_s12, %s201_s13  }
 0x1a0   :  { %196 = dma.done.wait [#allocation4], 256  }
 0x1a1   :  { %197 = vsyncadd [#allocation4], 4294967040 }
 0x1a2   :  { %152 = vsyncpa [#allocation4], 1 }

</bundles_post_ra>
